<compile_context>
chip_gen: v7x
topology: tpu7x:2x2x1
jax: 0.10.0
libtpu: 0.0.40
codegen_flags: <defaults>
</compile_context>

<pallas_src>
import functools
import math

import jax
import jax.numpy as jnp
from jax.experimental import pallas as pl
from jax.experimental.pallas import tpu as pltpu

BN_EPS = 1e-3
NEG_LARGE = -3.0e38  # acts as -inf for max pooling, representable in bf16


def _round_up(x, m):
    return (x + m - 1) // m * m


# ----------------------------------------------------------------------------
# Pallas kernels
# ----------------------------------------------------------------------------
def gemm_bias_act_kernel(p_ref, w_ref, b_ref, o_ref, acc_ref, *, act):
    """out = act((patches @ W) + bias); K-tiled reduction over grid axis 2."""
    k = pl.program_id(2)

    @pl.when(k == 0)
    def _():
        acc_ref[...] = jnp.zeros_like(acc_ref)

    acc_ref[...] += jnp.dot(p_ref[...], w_ref[...],
                            preferred_element_type=jnp.float32)

    @pl.when(k == pl.num_programs(2) - 1)
    def _():
        y = acc_ref[...] + b_ref[...]
        if act:  # SiLU
            y = y * jax.nn.sigmoid(y)
        o_ref[...] = y.astype(o_ref.dtype)


def maxpool_kernel(p_ref, o_ref):
    """p_ref: (kk, tm, C) window-shifted taps -> elementwise max over taps."""
    kk = p_ref.shape[0]
    acc = p_ref[0]
    for t in range(1, kk):
        acc = jnp.maximum(acc, p_ref[t])
    o_ref[...] = acc


# ----------------------------------------------------------------------------
# Pallas wrappers
# ----------------------------------------------------------------------------
def _pick_tk(K):
    if K <= 512:
        return _round_up(K, 128)
    best_kp, best_tk = None, None
    for c in (512, 384, 256):
        kp = _round_up(K, c)
        if best_kp is None or kp < best_kp or (kp == best_kp and c > best_tk):
            best_kp, best_tk = kp, c
    return best_tk


def fused_gemm(patches, w, bias, act, out_dtype):
    """patches: (M, K), w: (K, N) [both cast to bf16], bias: (N,) f32."""
    M, K = patches.shape
    _, N = w.shape
    tm = min(256, _round_up(M, 16))
    tn = min(256, _round_up(N, 128))
    tk = _pick_tk(K)
    Mp, Np, Kp = _round_up(M, tm), _round_up(N, tn), _round_up(K, tk)

    p = patches.astype(jnp.bfloat16)
    wp = w.astype(jnp.bfloat16)
    if Mp != M or Kp != K:
        p = jnp.pad(p, ((0, Mp - M), (0, Kp - K)))
    if Kp != K or Np != N:
        wp = jnp.pad(wp, ((0, Kp - K), (0, Np - N)))
    bp = bias.astype(jnp.float32).reshape(1, -1)
    if Np != N:
        bp = jnp.pad(bp, ((0, 0), (0, Np - N)))

    out = pl.pallas_call(
        functools.partial(gemm_bias_act_kernel, act=act),
        out_shape=jax.ShapeDtypeStruct((Mp, Np), out_dtype),
        grid_spec=pltpu.PrefetchScalarGridSpec(
            num_scalar_prefetch=0,
            grid=(Mp // tm, Np // tn, Kp // tk),
            in_specs=[
                pl.BlockSpec((tm, tk), lambda i, j, k: (i, k)),
                pl.BlockSpec((tk, tn), lambda i, j, k: (k, j)),
                pl.BlockSpec((1, tn), lambda i, j, k: (0, j)),
            ],
            out_specs=pl.BlockSpec((tm, tn), lambda i, j, k: (i, j)),
            scratch_shapes=[pltpu.VMEM((tm, tn), jnp.float32)],
        ),
        compiler_params=pltpu.CompilerParams(
            dimension_semantics=("parallel", "parallel", "arbitrary"),
            vmem_limit_bytes=48 * 1024 * 1024,
        ),
    )(p, wp, bp)
    if Mp != M or Np != N:
        out = out[:M, :N]
    return out


def max_pool2d(x, k, s, p):
    """NHWC max pool, Pallas reduction tiled over output rows."""
    N, H, W, C = x.shape
    xp = jnp.pad(x, ((0, 0), (p, p), (p, p), (0, 0)), constant_values=NEG_LARGE)
    Ho = (H + 2 * p - k) // s + 1
    Wo = (W + 2 * p - k) // s + 1
    kk = k * k
    cols = [xp[:, ky:ky + s * Ho:s, kx:kx + s * Wo:s, :]
            for ky in range(k) for kx in range(k)]
    stacked = jnp.stack(cols, axis=0).reshape(kk, N * Ho * Wo, C)

    M = N * Ho * Wo
    itemsize = jnp.dtype(x.dtype).itemsize
    tm_cap = max(16, (4 * 1024 * 1024) // (kk * C * itemsize) // 16 * 16)
    tm = min(512, _round_up(M, 16), tm_cap)
    Mp = _round_up(M, tm)
    if Mp != M:
        stacked = jnp.pad(stacked, ((0, 0), (0, Mp - M), (0, 0)),
                          constant_values=NEG_LARGE)

    out = pl.pallas_call(
        maxpool_kernel,
        out_shape=jax.ShapeDtypeStruct((Mp, C), x.dtype),
        grid=(Mp // tm,),
        in_specs=[pl.BlockSpec((kk, tm, C), lambda i: (0, i, 0))],
        out_specs=pl.BlockSpec((tm, C), lambda i: (i, 0)),
        compiler_params=pltpu.CompilerParams(
            dimension_semantics=("parallel",)),
    )(stacked)
    return out[:M].reshape(N, Ho, Wo, C)


# ----------------------------------------------------------------------------
# im2col glue + layer ops
# ----------------------------------------------------------------------------
def extract_patches(x, k, s, p):
    """x: (N,H,W,C) -> (N*Ho*Wo, k*k*C) patch matrix (tap-major K layout)."""
    N, H, W, C = x.shape
    xp = jnp.pad(x, ((0, 0), (p, p), (p, p), (0, 0)))
    Ho = (H + 2 * p - k) // s + 1
    Wo = (W + 2 * p - k) // s + 1
    cols = [xp[:, ky:ky + s * Ho:s, kx:kx + s * Wo:s, :]
            for ky in range(k) for kx in range(k)]
    patches = jnp.stack(cols, axis=3)  # (N, Ho, Wo, kk, C)
    return patches.reshape(N * Ho * Wo, k * k * C), Ho, Wo


def conv_block(x, p, out_dtype=jnp.bfloat16):
    """Conv2d(bias=False) + folded BN + optional SiLU, in NHWC."""
    N, H, W, C = x.shape
    k, s, pad = p["k"], p["s"], p["p"]
    if k == 1 and s == 1 and pad == 0:
        pm, Ho, Wo = x.reshape(N * H * W, C), H, W
    else:
        pm, Ho, Wo = extract_patches(x, k, s, pad)
    out = fused_gemm(pm, p["w"], p["bias"], p["act"], out_dtype)
    return out.reshape(N, Ho, Wo, -1)


def conv_block_pair(x, p1, p2, out_dtype=jnp.bfloat16):
    """Two sibling 1x1 convs on the same input fused into one lane-dense GEMM."""
    assert p1["k"] == 1 and p2["k"] == 1 and p1["s"] == 1 and p2["s"] == 1
    assert p1["act"] == p2["act"]
    N, H, W, C = x.shape
    pm = x.reshape(N * H * W, C)
    w = jnp.concatenate([p1["w"], p2["w"]], axis=1)
    b = jnp.concatenate([p1["bias"], p2["bias"]])
    n1 = p1["w"].shape[1]
    out = fused_gemm(pm, w, b, p1["act"], out_dtype).reshape(N, H, W, -1)
    return out[..., :n1], out[..., n1:]


def upsample2(x):
    return jnp.repeat(jnp.repeat(x, 2, axis=1), 2, axis=2)


# ----------------------------------------------------------------------------
# Parameter construction (deterministic, mirrors YoloBody.__init__ for phi='l')
# ----------------------------------------------------------------------------
class ParamGen:
    def __init__(self, key):
        self.key = key

    def _next(self):
        self.key, k = jax.random.split(self.key)
        return k

    def conv(self, c1, c2, k=1, s=1, p=None, act=True):
        if p is None:
            p = k // 2
        fan_in = k * k * c1
        w = jax.random.normal(self._next(), (fan_in, c2), jnp.float32) / math.sqrt(fan_in)
        # BN fold (gamma=1, beta=0, mean=0, var=1) directly into the weights
        w = w * (1.0 / math.sqrt(1.0 + BN_EPS))
        bias = jnp.zeros((c2,), jnp.float32)
        return dict(w=w.astype(jnp.bfloat16), bias=bias, k=k, s=s, p=p, act=act)

    def head(self, c1, c2):
        # plain Conv2d(k=1) with bias, no BN, no activation
        w = jax.random.normal(self._next(), (c1, c2), jnp.float32) / math.sqrt(c1)
        bias = 0.01 * jax.random.normal(self._next(), (c2,), jnp.float32)
        return dict(w=w.astype(jnp.bfloat16), bias=bias, k=1, s=1, p=0, act=False)


def mcb_params(pg, c1, c2, c3, n, e, ids):
    c_ = int(c2 * e)
    return dict(
        cv1=pg.conv(c1, c_, 1),
        cv2=pg.conv(c1, c_, 1),
        cv3=[pg.conv(c_ if i == 0 else c2, c2, 3) for i in range(n)],
        cv4=pg.conv(c_ * 2 + c2 * (len(ids) - 2), c3, 1),
        ids=list(ids),
    )


def tb_params(pg, c1, c2):
    return dict(cv1=pg.conv(c1, c2, 1), cv2=pg.conv(c1, c2, 1),
                cv3=pg.conv(c2, c2, 3, 2))


def sppcspc_params(pg, c1, c2, e=0.5):
    c_ = int(2 * c2 * e)
    return dict(cv1=pg.conv(c1, c_, 1), cv2=pg.conv(c1, c_, 1),
                cv3=pg.conv(c_, c_, 3), cv4=pg.conv(c_, c_, 1),
                cv5=pg.conv(4 * c_, c_, 1), cv6=pg.conv(c_, c_, 3),
                cv7=pg.conv(2 * c_, c2, 1))


def repconv_params(pg, c1, c2):
    # RepConv ('l'), c1 != c2 so rbr_identity is None:
    #   forward = SiLU(BN(conv3x3(x)) + BN(conv1x1(x)))
    # BN is affine -> fold the 1x1 branch into the center tap of the 3x3 weight
    # (same math as RepConv.fuse_repvgg_block), giving one fused GEMM.
    dense = pg.conv(c1, c2, 3, 1, act=False)
    r1x1 = pg.conv(c1, c2, 1, 1, p=0, act=False)
    w3 = dense["w"].astype(jnp.float32)
    w3 = w3.at[4 * c1:5 * c1, :].add(r1x1["w"].astype(jnp.float32))  # center tap
    bias = dense["bias"] + r1x1["bias"]
    return dict(w=w3.astype(jnp.bfloat16), bias=bias, k=3, s=1, p=1, act=True)


def init_yolobody_params(key, num_classes, phi="l"):
    assert phi == "l"
    tc, bc, pc = 32, 32, 32            # transition / block / panet channels
    e, n = 2, 4
    ids_b = [-1, -3, -5, -6]           # backbone ids for 'l'
    ids_h = [-1, -2, -3, -4, -5, -6]   # head ids for 'l'
    na = 3                             # len(anchors_mask[i])
    pg = ParamGen(key)

    P = {}
    # Backbone
    P["stem"] = [pg.conv(3, tc, 3, 1), pg.conv(tc, 2 * tc, 3, 2),
                 pg.conv(2 * tc, 2 * tc, 3, 1)]
    P["dark2_conv"] = pg.conv(2 * tc, 4 * tc, 3, 2)
    P["dark2_mcb"] = mcb_params(pg, 4 * tc, 2 * bc, 8 * tc, 4, 1, ids_b)
    P["dark3_tb"] = tb_params(pg, 8 * tc, 4 * tc)
    P["dark3_mcb"] = mcb_params(pg, 8 * tc, 4 * bc, 16 * tc, 4, 1, ids_b)
    P["dark4_tb"] = tb_params(pg, 16 * tc, 8 * tc)
    P["dark4_mcb"] = mcb_params(pg, 16 * tc, 8 * bc, 32 * tc, 4, 1, ids_b)
    P["dark5_tb"] = tb_params(pg, 32 * tc, 16 * tc)
    P["dark5_mcb"] = mcb_params(pg, 32 * tc, 8 * bc, 32 * tc, 4, 1, ids_b)
    # Head
    P["sppcspc"] = sppcspc_params(pg, 32 * tc, 16 * tc)
    P["conv_for_P5"] = pg.conv(16 * tc, 8 * tc, 1)
    P["conv_for_feat2"] = pg.conv(32 * tc, 8 * tc, 1)
    P["conv3_for_upsample1"] = mcb_params(pg, 16 * tc, 4 * pc, 8 * tc, n, e, ids_h)
    P["conv_for_P4"] = pg.conv(8 * tc, 4 * tc, 1)
    P["conv_for_feat1"] = pg.conv(16 * tc, 4 * tc, 1)
    P["conv3_for_upsample2"] = mcb_params(pg, 8 * tc, 2 * pc, 4 * tc, n, e, ids_h)
    P["down_sample1"] = tb_params(pg, 4 * tc, 4 * tc)
    P["conv3_for_downsample1"] = mcb_params(pg, 16 * tc, 4 * pc, 8 * tc, n, e, ids_h)
    P["down_sample2"] = tb_params(pg, 8 * tc, 8 * tc)
    P["conv3_for_downsample2"] = mcb_params(pg, 32 * tc, 8 * pc, 16 * tc, n, e, ids_h)
    P["rep_conv_1"] = repconv_params(pg, 4 * tc, 8 * tc)
    P["rep_conv_2"] = repconv_params(pg, 8 * tc, 16 * tc)
    P["rep_conv_3"] = repconv_params(pg, 16 * tc, 32 * tc)
    P["yolo_head_P3"] = pg.head(8 * tc, na * (5 + num_classes))
    P["yolo_head_P4"] = pg.head(16 * tc, na * (5 + num_classes))
    P["yolo_head_P5"] = pg.head(32 * tc, na * (5 + num_classes))
    return P


# ----------------------------------------------------------------------------
# Module forwards
# ----------------------------------------------------------------------------
def mcb_forward(x, p):
    x1, x2 = conv_block_pair(x, p["cv1"], p["cv2"])   # fused sibling 1x1 convs
    xs = [x1, x2]
    for cp in p["cv3"]:
        x2 = conv_block(x2, cp)
        xs.append(x2)
    cat = jnp.concatenate([xs[i] for i in p["ids"]], axis=-1)
    return conv_block(cat, p["cv4"])


def tb_forward(x, p):
    x1 = max_pool2d(x, 2, 2, 0)
    x1 = conv_block(x1, p["cv1"])
    x2 = conv_block(x, p["cv2"])
    x2 = conv_block(x2, p["cv3"])
    return jnp.concatenate([x2, x1], axis=-1)


def sppcspc_forward(x, p):
    c1_out, y2 = conv_block_pair(x, p["cv1"], p["cv2"])  # fused sibling 1x1 convs
    x1 = conv_block(conv_block(c1_out, p["cv3"]), p["cv4"])
    # SPPF equivalence: cascaded 5x5 stride-1 pools == k=5, 9, 13 pools
    m5 = max_pool2d(x1, 5, 1, 2)
    m9 = max_pool2d(m5, 5, 1, 2)
    m13 = max_pool2d(m9, 5, 1, 2)
    y1 = conv_block(conv_block(jnp.concatenate([x1, m5, m9, m13], axis=-1),
                               p["cv5"]), p["cv6"])
    return conv_block(jnp.concatenate([y1, y2], axis=-1), p["cv7"])


def backbone_forward(x, P):
    for cp in P["stem"]:
        x = conv_block(x, cp)
    x = conv_block(x, P["dark2_conv"])
    x = mcb_forward(x, P["dark2_mcb"])
    x = tb_forward(x, P["dark3_tb"])
    x = mcb_forward(x, P["dark3_mcb"])
    feat1 = x
    x = tb_forward(x, P["dark4_tb"])
    x = mcb_forward(x, P["dark4_mcb"])
    feat2 = x
    x = tb_forward(x, P["dark5_tb"])
    x = mcb_forward(x, P["dark5_mcb"])
    feat3 = x
    return feat1, feat2, feat3


def yolobody_forward(x_nchw, P):
    # NCHW -> NHWC, bf16 activations inside the network
    x = jnp.transpose(x_nchw, (0, 2, 3, 1)).astype(jnp.bfloat16)
    feat1, feat2, feat3 = backbone_forward(x, P)

    P5 = sppcspc_forward(feat3, P["sppcspc"])
    P5_conv = conv_block(P5, P["conv_for_P5"])
    P5_up = upsample2(P5_conv)
    P4 = jnp.concatenate([conv_block(feat2, P["conv_for_feat2"]), P5_up], axis=-1)
    P4 = mcb_forward(P4, P["conv3_for_upsample1"])

    P4_conv = conv_block(P4, P["conv_for_P4"])
    P4_up = upsample2(P4_conv)
    P3 = jnp.concatenate([conv_block(feat1, P["conv_for_feat1"]), P4_up], axis=-1)
    P3 = mcb_forward(P3, P["conv3_for_upsample2"])

    P3_down = tb_forward(P3, P["down_sample1"])
    P4 = jnp.concatenate([P3_down, P4], axis=-1)
    P4 = mcb_forward(P4, P["conv3_for_downsample1"])

    P4_down = tb_forward(P4, P["down_sample2"])
    P5 = jnp.concatenate([P4_down, P5], axis=-1)
    P5 = mcb_forward(P5, P["conv3_for_downsample2"])

    # RepConv (weights pre-fused: one 3x3 conv + SiLU each)
    P3 = conv_block(P3, P["rep_conv_1"])
    P4 = conv_block(P4, P["rep_conv_2"])
    P5 = conv_block(P5, P["rep_conv_3"])

    out2 = conv_block(P3, P["yolo_head_P3"], out_dtype=jnp.float32)
    out1 = conv_block(P4, P["yolo_head_P4"], out_dtype=jnp.float32)
    out0 = conv_block(P5, P["yolo_head_P5"], out_dtype=jnp.float32)

    # NHWC -> NCHW to match PyTorch output convention
    to_nchw = lambda t: jnp.transpose(t, (0, 3, 1, 2))
    return [to_nchw(out0), to_nchw(out1), to_nchw(out2)]


# ----------------------------------------------------------------------------
if __name__ == "__main__":
    key = jax.random.PRNGKey(0)
    pkey, xkey = jax.random.split(key)

    num_classes = 2
    params = init_yolobody_params(pkey, num_classes=num_classes, phi="l")

    # Small input consistent with the module: NCHW, 3-channel image, /32-divisible
    x = jax.random.normal(xkey, (2, 3, 32, 32), jnp.float32)

    outs = yolobody_forward(x, params)
    outs = jax.block_until_ready(outs)

    expected = [(2, 3 * (5 + num_classes), 1, 1),
                (2, 3 * (5 + num_classes), 2, 2),
                (2, 3 * (5 + num_classes), 4, 4)]
    assert [tuple(o.shape) for o in outs] == expected, [o.shape for o in outs]
    assert all(bool(jnp.all(jnp.isfinite(o))) for o in outs)
    print("KERNEL_OK")
</pallas_src>

<mosaic_0001>
module attributes {stable_mosaic.version = 11 : i64} {
  func.func @gemm_bias_act_kernel(%arg0: i32, %arg1: i32, %arg2: i32, %arg3: memref<256x128xbf16, #tpu.memory_space<vmem>>, %arg4: memref<128x128xbf16, #tpu.memory_space<vmem>>, %arg5: memref<1x128xf32, #tpu.memory_space<vmem>>, %arg6: memref<256x128xbf16, #tpu.memory_space<vmem>>, %arg7: memref<256x128xf32, #tpu.memory_space<vmem>>) attributes {dimension_semantics = [#tpu.dimension_semantics<parallel>, #tpu.dimension_semantics<parallel>, #tpu.dimension_semantics<arbitrary>], iteration_bounds = array<i64: 8, 1, 1>, scalar_prefetch = 0 : i64, scratch_operands = 1 : i64, tpu.core_type = #tpu.core_type<tc>, window_params = [{transform_indices = @transform_0, window_bounds = array<i64: 256, 128>}, {transform_indices = @transform_1, window_bounds = array<i64: 128, 128>}, {transform_indices = @transform_2, window_bounds = array<i64: 1, 128>}, {transform_indices = @transform_3, window_bounds = array<i64: 256, 128>}]} {
    %c0_i32 = arith.constant 0 : i32
    %0 = arith.cmpi eq, %arg2, %c0_i32 : i32
    %1 = arith.extui %0 : i1 to i32
    %c0_i32_0 = arith.constant 0 : i32
    %2 = arith.cmpi ne, %1, %c0_i32_0 : i32
    scf.if %2 {
      %cst_10 = arith.constant 0.000000e+00 : f32
      %12 = vector.broadcast %cst_10 : f32 to vector<256x128xf32>
      %c0_11 = arith.constant 0 : index
      %c0_12 = arith.constant 0 : index
      %13 = vector.load %arg7[%c0_11, %c0_12] : memref<256x128xf32, #tpu.memory_space<vmem>>, vector<256x128xf32>
      tpu.vector_store %arg7[%c0_11, %c0_12], %12 {strides = array<i32>} : memref<256x128xf32, #tpu.memory_space<vmem>>, vector<256x128xf32>,
    } else {
    }
    %c0 = arith.constant 0 : index
    %c0_1 = arith.constant 0 : index
    %3 = vector.load %arg7[%c0, %c0_1] : memref<256x128xf32, #tpu.memory_space<vmem>>, vector<256x128xf32>
    %c0_2 = arith.constant 0 : index
    %c0_3 = arith.constant 0 : index
    %4 = vector.load %arg3[%c0_2, %c0_3] : memref<256x128xbf16, #tpu.memory_space<vmem>>, vector<256x128xbf16>
    %c0_4 = arith.constant 0 : index
    %c0_5 = arith.constant 0 : index
    %5 = vector.load %arg4[%c0_4, %c0_5] : memref<128x128xbf16, #tpu.memory_space<vmem>>, vector<128x128xbf16>
    %cst = arith.constant dense<0.000000e+00> : vector<256x128xf32>
    %6 = tpu.matmul %4, %5, %cst {dimension_numbers = #tpu.dot_dimension_numbers<[1], [0], [0], [1], [0, 0, 1, 1], [], []>} : vector<256x128xbf16>, vector<128x128xbf16>, vector<256x128xf32> -> vector<256x128xf32>
    %7 = arith.addf %3, %6 : vector<256x128xf32>
    %c0_6 = arith.constant 0 : index
    %c0_7 = arith.constant 0 : index
    %8 = vector.load %arg7[%c0_6, %c0_7] : memref<256x128xf32, #tpu.memory_space<vmem>>, vector<256x128xf32>
    tpu.vector_store %arg7[%c0_6, %c0_7], %7 {strides = array<i32>} : memref<256x128xf32, #tpu.memory_space<vmem>>, vector<256x128xf32>,
    %c0_i32_8 = arith.constant 0 : i32
    %9 = arith.cmpi eq, %arg2, %c0_i32_8 : i32
    %10 = arith.extui %9 : i1 to i32
    %c0_i32_9 = arith.constant 0 : i32
    %11 = arith.cmpi ne, %10, %c0_i32_9 : i32
    scf.if %11 {
      %c0_10 = arith.constant 0 : index
      %c0_11 = arith.constant 0 : index
      %12 = vector.load %arg7[%c0_10, %c0_11] : memref<256x128xf32, #tpu.memory_space<vmem>>, vector<256x128xf32>
      %c0_12 = arith.constant 0 : index
      %c0_13 = arith.constant 0 : index
      %13 = vector.load %arg5[%c0_12, %c0_13] : memref<1x128xf32, #tpu.memory_space<vmem>>, vector<1x128xf32>
      %14 = vector.broadcast %13 : vector<1x128xf32> to vector<256x128xf32>
      %15 = arith.addf %12, %14 : vector<256x128xf32>
      %16 = arith.negf %15 : vector<256x128xf32>
      %17 = math.exp %16 : vector<256x128xf32>
      %cst_14 = arith.constant 1.000000e+00 : f32
      %18 = vector.broadcast %cst_14 : f32 to vector<256x128xf32>
      %19 = arith.addf %18, %17 : vector<256x128xf32>
      %20 = arith.divf %18, %19 : vector<256x128xf32>
      %21 = arith.mulf %15, %20 : vector<256x128xf32>
      %22 = arith.truncf %21 : vector<256x128xf32> to vector<256x128xbf16>
      %c0_15 = arith.constant 0 : index
      %c0_16 = arith.constant 0 : index
      %23 = vector.load %arg6[%c0_15, %c0_16] : memref<256x128xbf16, #tpu.memory_space<vmem>>, vector<256x128xbf16>
      tpu.vector_store %arg6[%c0_15, %c0_16], %22 {strides = array<i32>} : memref<256x128xbf16, #tpu.memory_space<vmem>>, vector<256x128xbf16>,
    } else {
    }
    return
  }
  func.func @transform_0(%arg0: i32, %arg1: i32, %arg2: i32) -> (i32, i32) {
    %c0_i32 = arith.constant 0 : i32
    return %arg0, %arg2 : i32, i32
  }
  func.func @transform_1(%arg0: i32, %arg1: i32, %arg2: i32) -> (i32, i32) {
    %c0_i32 = arith.constant 0 : i32
    return %arg2, %arg1 : i32, i32
  }
  func.func @transform_2(%arg0: i32, %arg1: i32, %arg2: i32) -> (i32, i32) {
    %c0_i32 = arith.constant 0 : i32
    %c0_i32_0 = arith.constant 0 : i32
    return %c0_i32, %arg1 : i32, i32
  }
  func.func @transform_3(%arg0: i32, %arg1: i32, %arg2: i32) -> (i32, i32) {
    %c0_i32 = arith.constant 0 : i32
    return %arg0, %arg1 : i32, i32
  }
}

</mosaic_0001>

<bundles_post_ra>
// kernel: tpu_custom_call.1
= control target key start
LH: loop header
LB: loop body
LE: loop exit
PB: predicated region body
PF: predicated region fallthrough
CT: control target
= control target key end

     0   :  { %8 = vsyncpa [#allocation4], 0  ;;  %s2511_s0 = inlined_call_operand.hbm [shape: bf16[2048,128], index: 0, kind: input, shape index: {}]   ;;  %s2512_s1 = inlined_call_operand.hbm [shape: bf16[128,128], index: 1, kind: input, shape index: {}]   ;;  %s2513_s2 = inlined_call_operand.vmem [shape: f32[1,128], index: 2, kind: input, shape index: {}]   ;;  %s2514_s3 = inlined_call_operand.hbm [shape: bf16[2048,128], index: 3, kind: output, shape index: {}]  }
   0x1   :  { %10 = vsyncpa [#allocation4 + $0x1], 0 }
   0x2   :  { %11 = vsyncpa [#allocation7], 0 }
   0x3   :  { %12 = vsyncpa [#allocation5], 0 }
   0x4   :  { %14 = vsyncpa [#allocation5 + $0x1], 0  ;;  %s2055_s12 = smov 0   ;;  %s2057_s13 = smov 0  }
   0x5   :  { %s2059_s14 = smov 0   ;;  %s2061_s15 = smov 0  }
   0x6   :  { %s2063_s16 = smov 0   ;;  %s2065_s17 = smov 0  }
   0x7 LB: > { %s1329_s18 = sadd.s32 4294967295, %s2026_s17   ;;  %s1330_s19 = sadd.s32 4294967294, %s2026_s17   ;;  %s2026_s17 = sphi %s2065_s17, %s20_s17   ;;  %s2022_s16 = sphi %s2063_s16, %s2537_s16   ;;  %s2018_s15 = sphi %s2061_s15, %s2536_s15   ;;  %s2014_s14 = sphi %s2059_s14, %s2535_s14   ;;  %s2010_s13 = sphi %s2057_s13, %s2534_s13   ;;  %s2006_s12 = sphi %s2055_s12, %s2533_s12  }
   0x8   : > { %p61_p0 = scmp.ne.s32.totalorder %s2010_s13, %s2006_s12  ;;  %p2089_p1 = scmp.eq.s32.totalorder %s1329_s18, 0 }
   0x9   : > { %p2093_p2 = scmp.eq.s32.totalorder %s1329_s18, 7  ;;  %p147_p3 = scmp.eq.s32.totalorder %s1330_s19, 7 }
   0xa   : > { %s2519_s20 = scalar_select %p2089_p1, 1, 0 }
   0xb   : > { %s2520_s21 = scalar_select %p2093_p2, 1, 0 }
   0xc   : > { %p2099_p4 = por %p2089_p1, %p61_p0  ;;  %p1331_p5 = scmp.ge.s32.totalorder %s2026_s17, 1 }
   0xd   : > { %p2104_p6 = por %p147_p3, %p61_p0  ;;  %p154_p7 = scmp.lt.s32.totalorder %s2026_s17, 9 }
   0xe   : > { %s2521_s22 = scalar_select %p2099_p4, 1, 0 }
   0xf   : > { %s2522_s23 = scalar_select %p2104_p6, 1, 0 }
  0x10   : > { %p2109_p8 = pnand %p1331_p5, %p154_p7  ;;  %s2028_s25 = smov [#allocation6]  }
  0x11   : > { %s170_s26 = sshll.u32 %s2028_s25, 4  ;;  %s39_s28 = sadd.s32 1, %s2022_s16  ;;  %s171_s26 = int_to_ptr.vmem [resolvable:$true] %s170_s26 }
  0x12   : > { %s2523_s24 = scalar_select %p2109_p8, 1, 0 }
  0x13   : > { %p1661_p9 = pneg %p2109_p8  ;;  %s1882_s4 = scalar_lea.hbm %s2512_s1, 1024 }
  0x14   : > { %p1883_p11 = scmp.ne.s32.totalorder %s2512_s1, %s1882_s4  ;;  %p1889_p3 = scmp.lt.u32.totalorder %s1882_s4, %s2512_s1 }
  0x15   : > { %p2117_p10 = pnand %p1661_p9, %p2089_p1 }
  0x17   : > { %p1884_p12 = pneg %p2117_p10 }
  0x19   : > { %p1885_p13 = pnand %p1884_p12, %p1883_p11 }
  0x1b   : > { %p1886_p0 = pneg %p1885_p13 }
  0x1d   : > { %p1891_p5 = pnand %p1889_p3, %p1886_p0 }
  0x1f   : > { %1894 = shalt.err (!%p1891_p5)
}
  0x20   : > { %s1895_s9 = scalar_lea.vmem %s171_s26, 1024  ;;  %p1903_p1 = scmp.lt.s32.totalorder %s171_s26, %s171_s26 }
  0x21   : > { %p1896_p7 = scmp.ne.s32.totalorder %s171_s26, %s1895_s9  ;;  %p1904_p4 = scmp.lt.s32.totalorder %s1895_s9, %s1895_s9 }
  0x23   : > { %p1898_p9 = pnand %p1896_p7, %p1884_p12  ;;  %p1905_p8 = por %p1904_p4, %p1903_p1 }
  0x25   : > { %p1899_p6 = pneg %p1898_p9 }
  0x27   : > { %p1906_p2 = pnand %p1905_p8, %p1899_p6 }
  0x29   : > { %1909 = shalt.err (!%p1906_p2)
}
  0x2a   : > { %s2029_s10 = smov 64   ;;  %s2030_s11 = smov 4  }
  0x2b   : > { %1664 = dma.hbm_to_vmem [thread:$0]  (!%p2117_p10), %s2512_s1, 1024, %s171_s26, [#allocation7], %s2029_s10, %s2029_s10, %s2030_s11  }
  0x2c   : > { %p41_p1 = scmp.ge.s32.totalorder %s39_s28, 8  ;;  %s48_s25 = sadd.s32 1, %s2014_s14 }
  0x2d   : > { %p55_p2 = scmp.ne.s32.totalorder %s2014_s14, %s2010_s13  ;;  %p56_p4 = scmp.eq.s32.totalorder %s2026_s17, 0 }
  0x2e   : > { %s2539_s28 = smov (%p41_p1, %s39_s28), 0  ;;  %p2526_p8 = scmp.ne.s32.totalorder %s2520_s21, 0 }
  0x2f   : > { %p2147_p6 = por %p56_p4, %p55_p2  ;;  %s43_s30 = ssub.s32 %s2022_s16, %s2539_s28 }
  0x30   : > { %p2153_p11 = por %p2526_p8, %p55_p2  ;;  %p1674_p12 = scmp.lt.s32.totalorder %s2026_s17, 8 }
  0x31   : > { %p46_p10 = scmp.eq.s32.totalorder %s43_s30, 0  ;;  %s190_s26 = sand.u32 1, %s2014_s14  }
  0x32   : > { %s1335_s4 = sshll.u32 %s190_s26, 7  ;;  %s1436_s6 = sshll.u32 %s2022_s16, 11 }
  0x33   : > { %s2162_s5 = scalar_select %p46_p10, %s2014_s14, %s48_s25  }
  0x34   : > { %s2168_s9 = scalar_lea.hbm %s2511_s0, %s1436_s6  ;;  %s194_s21 = scalar_lea.vmem [#allocation3], %s1335_s4 }
  0x35   : > { %s202_s18 = sshll.u32 %s194_s21, 4  ;;  %p2174_p13 = pnand %p1674_p12, %p2147_p6  ;;  %s2170_s18 = int_to_ptr.vmem [resolvable:$true] %s202_s18 }
  0x36   : > { %s2178_s25 = scalar_lea.sflag [#allocation4], %s190_s26  ;;  %s1910_s30 = scalar_lea.hbm %s2168_s9, 2048 }
  0x37   : > { %p1911_p0 = scmp.ne.s32.totalorder %s2168_s9, %s1910_s30  ;;  %p1912_p3 = pneg %p2174_p13 }
  0x38   : > { %s1915_s29 = scalar_lea.hbm %s2511_s0, 16384  ;;  %p1916_p9 = scmp.lt.u32.totalorder %s2168_s9, %s2511_s0 }
  0x39   : > { %p1913_p5 = pnand %p1912_p3, %p1911_p0  ;;  %p1917_p1 = scmp.lt.u32.totalorder %s1915_s29, %s1910_s30 }
  0x3a   : > { %p1919_p4 = scmp.lt.u32.totalorder %s1910_s30, %s2168_s9 }
  0x3b   : > { %p1914_p7 = pneg %p1913_p5  ;;  %p1918_p2 = por %p1917_p1, %p1916_p9 }
  0x3d   : > { %p1920_p6 = por %p1919_p4, %p1918_p2 }
  0x3f   : > { %p1921_p8 = pnand %p1920_p6, %p1914_p7 }
  0x41   : > { %1924 = shalt.err (!%p1921_p8)
}
  0x42   : > { %s1925_s26 = scalar_lea.vmem %s2170_s18, 2048  ;;  %s2031_s21 = smov [#allocation3]  }
  0x43   : > { %p1926_p12 = scmp.ne.s32.totalorder %s2170_s18, %s1925_s26  ;;  %s1930_s4 = sshll.u32 %s2031_s21, 4  ;;  %s1931_s4 = int_to_ptr.vmem [resolvable:$false] %s1930_s4 }
  0x44   : > { %s1932_s6 = scalar_lea.vmem %s1931_s4, 4096  ;;  %p1933_p5 = scmp.lt.s32.totalorder %s2170_s18, %s1931_s4 }
  0x45   : > { %p1928_p10 = pnand %p1926_p12, %p1912_p3  ;;  %p1934_p9 = scmp.lt.s32.totalorder %s1932_s6, %s1925_s26 }
  0x47   : > { %p1929_p0 = pneg %p1928_p10  ;;  %p1935_p1 = por %p1934_p9, %p1933_p5 }
  0x49   : > { %p1936_p2 = pnand %p1935_p1, %p1929_p0 }
  0x4b   : > { %1939 = shalt.err (!%p1936_p2)
}
  0x4c   : > { %1668 = dma.hbm_to_vmem [thread:$0]  (!%p2174_p13), %s2168_s9, 2048, %s2170_s18, %s2178_s25, %s2029_s10, %s2029_s10, %s2030_s11  }
  0x4d   : > { %p2529_p3 = scmp.ne.s32.totalorder %s2523_s24, 0 }
  0x4e   : > { %s2212_s30 = sand.u32 (!%p2529_p3), 1, %s2010_s13   ;;  %p2530_p7 = scmp.ne.s32.totalorder (!%p2529_p3), %s2521_s22, 0 }
  0x4f   : > { %214 = sbr.rel (%p2529_p3) target bundleno = 439 (0x1b7), region = 32  ;;  %s1339_s29 = sshll.u32 (!%p2529_p3), %s2212_s30, 7 }
  0x50   : > { %s217_s7 = scalar_lea.sflag (!%p2529_p3), [#allocation4], %s2212_s30  ;;  %s2218_s19 = scalar_lea.vmem (!%p2529_p3), [#allocation3], %s1339_s29 }
  0x56   : > { %1993 = dma.done.wait (%p2530_p7), %s217_s7, 2048  }
  0x57   : > { %1995 = vsyncadd (%p2530_p7), %s217_s7, 4294965248  ;;  %p2531_p13 = scmp.ne.s32.totalorder %s2519_s20, 0 }
  0x59   : > { %1997 = dma.done.wait (%p2531_p13), [#allocation7], 1024  }
  0x5a   : > { %1999 = vsyncadd (%p2531_p13), [#allocation7], 4294966272  ;;  %v1730_v0 = vld [vmem:[#allocation6] sm:$0xff]   ;;  %v1731_v1 = vld [vmem:[#allocation6 + $0x8] sm:$0xff]   ;;  %s2374_s24 = scalar_lea.vmem [#allocation8], %s1339_s29  ;;  %s1469_s10 = sshll.u32 %s2018_s15, 11 }
  0x5b   : > { %1589 = vmatprep.subr.bf16.mxu0 %v1730_v0  ;;  %1637 = vmatprep.subr.bf16.mxu1 %v1730_v0  ;;  %v1732_v2 = vld [vmem:[#allocation6 + $0x10] sm:$0xff]   ;;  %v1733_v3 = vld [vmem:[#allocation6 + $0x18] sm:$0xff]   ;;  %v1738_v4 = vld [vmem:[%s2218_s19] sm:$0xff]   ;;  %s1215_s11 = sshll.u32 %s2374_s24, 4  ;;  %s2458_s15 = scalar_lea.hbm %s2514_s3, %s1469_s10  ;;  %s2460_s11 = int_to_ptr.vmem [resolvable:$true] %s1215_s11 }
  0x5c   : > { %1590 = vmatpush3.bf16.msra.mxu0 %v1730_v0  ;;  %1645 = vmatpush3.bf16.msra.mxu1 %v1730_v0  ;;  %v1739_v5 = vld [vmem:[%s2218_s19 + $0x40] sm:$0xff]   ;;  %v1735_v7 = vld [vmem:[#allocation6 + $0x28] sm:$0xff]   ;;  %v1736_v8 = vld [vmem:[#allocation6 + $0x30] sm:$0xff]   ;;  %s1201_s25 = scalar_lea.sflag [#allocation5], %s2212_s30  ;;  %s1940_s8 = scalar_lea.vmem %s2460_s11, 2048 }
  0x5d   : > { %1591 = vmatprep.subr.bf16.mxu0 %v1731_v1  ;;  %1638 = vmatprep.subr.bf16.mxu1 %v1731_v1  ;;  %v1734_v6 = vld [vmem:[#allocation6 + $0x20] sm:$0xff]   ;;  %v1737_v9 = vld [vmem:[#allocation6 + $0x38] sm:$0xff]   ;;  %v1740_v10 = vld [vmem:[%s2218_s19 + $0x8] sm:$0xff]   ;;  %p1941_p4 = scmp.ne.s32.totalorder %s2460_s11, %s1940_s8  ;;  %s2032_s26 = smov [#allocation8]  }
  0x5e   : > { %1605 = vmatprep.mubr.bf16.mxu0 %v1738_v4  ;;  %1621 = vmatprep.mubr.bf16.mxu1 %v1739_v5  ;;  %v1741_v11 = vld [vmem:[%s2218_s19 + $0x48] sm:$0xff]   ;;  %v1742_v12 = vld [vmem:[%s2218_s19 + $0x10] sm:$0xff]   ;;  %v1744_v14 = vld [vmem:[%s2218_s19 + $0x18] sm:$0xff]   ;;  %s1944_s21 = sshll.u32 %s2032_s26, 4  ;;  %s1945_s21 = int_to_ptr.vmem [resolvable:$false] %s1944_s21 }
  0x5f   : > { %v1743_v13 = vld [vmem:[%s2218_s19 + $0x50] sm:$0xff]   ;;  %v1745_v15 = vld [vmem:[%s2218_s19 + $0x58] sm:$0xff]   ;;  %v1746_v16 = vld [vmem:[%s2218_s19 + $0x20] sm:$0xff]   ;;  %p1942_p6 = pnand %p1941_p4, %p2153_p11  ;;  %s1946_s4 = scalar_lea.vmem %s1945_s21, 4096 }
  0x60   : > { %1592 = vmatpush3.bf16.msra.mxu0 %v1731_v1  ;;  %1646 = vmatpush3.bf16.msra.mxu1 %v1731_v1  ;;  %v1747_v17 = vld [vmem:[%s2218_s19 + $0x60] sm:$0xff]   ;;  %v1748_v18 = vld [vmem:[%s2218_s19 + $0x28] sm:$0xff]   ;;  %v1750_v20 = vld [vmem:[%s2218_s19 + $0x30] sm:$0xff]   ;;  %p1947_p12 = scmp.lt.s32.totalorder %s2460_s11, %s1945_s21  ;;  %p1948_p10 = scmp.lt.s32.totalorder %s1946_s4, %s1940_s8 }
  0x61   : > { %1593 = vmatprep.subr.bf16.mxu0 %v1732_v2  ;;  %1639 = vmatprep.subr.bf16.mxu1 %v1732_v2  ;;  %v1749_v19 = vld [vmem:[%s2218_s19 + $0x68] sm:$0xff]   ;;  %v1751_v21 = vld [vmem:[%s2218_s19 + $0x70] sm:$0xff]   ;;  %v1752_v22 = vld [vmem:[%s2218_s19 + $0x38] sm:$0xff]   ;;  %p1943_p8 = pneg %p1942_p6 }
  0x62   : > { %v1753_v23 = vld [vmem:[%s2218_s19 + $0x78] sm:$0xff]   ;;  %v2247_v24 = vld [vmem:[%s2513_s2] ss:$0 sm:$0xff]  ;;  %p1949_p0 = por %p1948_p10, %p1947_p12 }
  0x64   : > { %1594 = vmatpush3.bf16.msra.mxu0 %v1732_v2  ;;  %1647 = vmatpush3.bf16.msra.mxu1 %v1732_v2  ;;  %p1950_p5 = pnand %p1949_p0, %p1943_p8 }
  0x65   : > { %1595 = vmatprep.subr.bf16.mxu0 %v1733_v3  ;;  %1640 = vmatprep.subr.bf16.mxu1 %v1733_v3 }
  0x68   : > { %1596 = vmatpush3.bf16.msra.mxu0 %v1733_v3  ;;  %1648 = vmatpush3.bf16.msra.mxu1 %v1733_v3 }
  0x69   : > { %1597 = vmatprep.subr.bf16.mxu0 %v1734_v6  ;;  %1641 = vmatprep.subr.bf16.mxu1 %v1734_v6 }
  0x6c   : > { %1598 = vmatpush3.bf16.msra.mxu0 %v1734_v6  ;;  %1649 = vmatpush3.bf16.msra.mxu1 %v1734_v6 }
  0x6d   : > { %1599 = vmatprep.subr.bf16.mxu0 %v1735_v7  ;;  %1642 = vmatprep.subr.bf16.mxu1 %v1735_v7 }
  0x70   : > { %1600 = vmatpush3.bf16.msra.mxu0 %v1735_v7  ;;  %1650 = vmatpush3.bf16.msra.mxu1 %v1735_v7 }
  0x71   : > { %1601 = vmatprep.subr.bf16.mxu0 %v1736_v8  ;;  %1643 = vmatprep.subr.bf16.mxu1 %v1736_v8 }
  0x74   : > { %1602 = vmatpush3.bf16.msra.mxu0 %v1736_v8  ;;  %1651 = vmatpush3.bf16.msra.mxu1 %v1736_v8 }
  0x75   : > { %1603 = vmatprep.subr.bf16.mxu0 %v1737_v9  ;;  %1644 = vmatprep.subr.bf16.mxu1 %v1737_v9 }
  0x78   : > { %1604 = vmatpush3.bf16.msra.mxu0 %v1737_v9  ;;  %1652 = vmatpush3.bf16.msra.mxu1 %v1737_v9 }
  0x7b   : > { %1606 = vmatmul.mubr.bf16.vlgmr.msra.gmra.mrb[0].mxu0 %v1740_v10  ;;  %1622 = vmatmul.mubr.bf16.vlgmr.msra.gmra.mrb[0].mxu1 %v1741_v11 }
  0x7c   : > { %1609 = vmatprep.mubr.bf16.mxu0 %v1742_v12  ;;  %1625 = vmatprep.mubr.bf16.mxu1 %v1743_v13 }
  0x83   : > { %1610 = vmatmul.mubr.bf16.gmra.mrb[4].mxu0 %v1744_v14  ;;  %1626 = vmatmul.mubr.bf16.gmra.mrb[4].mxu1 %v1745_v15 }
  0x84   : > { %1613 = vmatprep.mubr.bf16.mxu0 %v1746_v16  ;;  %1629 = vmatprep.mubr.bf16.mxu1 %v1747_v17 }
  0x8b   : > { %1614 = vmatmul.mubr.bf16.gmra.mrb[8].mxu0 %v1748_v18  ;;  %1630 = vmatmul.mubr.bf16.gmra.mrb[8].mxu1 %v1749_v19 }
  0x8c   : > { %1617 = vmatprep.mubr.bf16.mxu0 %v1750_v20  ;;  %1633 = vmatprep.mubr.bf16.mxu1 %v1751_v21 }
  0x93   : > { %1618 = vmatmul.mubr.bf16.gmra.mrb[12].mxu0 %v1752_v22  ;;  %1634 = vmatmul.mubr.bf16.gmra.mrb[12].mxu1 %v1753_v23 }
 0x14e   : > { %v1607_v25 = vpop.f32.mrb[0].mxu0  ;;  %v1623_v26 = vpop.f32.mrb[0].mxu1 }
 0x14f   : > { %v2250_v27 = vadd.f32 %v1607_v25, %v2247_v24  ;;  %v2253_v28 = vadd.f32 %v1623_v26, %v2247_v24  ;;  %v551_v29 = vpop.f32.mrb[1].mxu0  ;;  %v615_v30 = vpop.f32.mrb[1].mxu1 }
 0x150   : > { %v2256_v31 = vadd.f32 %v2247_v24, %v551_v29  ;;  %v2259_v32 = vadd.f32 %v2247_v24, %v615_v30  ;;  %v1608_v33 = vpop.f32.mrb[2].mxu0  ;;  %v1624_v34 = vpop.f32.mrb[2].mxu1 }
 0x151   : > { %v1369_v35 = vmul.f32 -1.442695, %v2250_v27  ;;  %v1385_v36 = vmul.f32 -1.442695, %v2253_v28  ;;  %v2264_v37 = vadd.f32 %v1608_v33, %v2247_v24  ;;  %v2267_v38 = vadd.f32 %v1624_v34, %v2247_v24  ;;  %v554_v39 = vpop.f32.mrb[3].mxu0  ;;  %v618_v40 = vpop.f32.mrb[3].mxu1 }
 0x152   : > { %v1367_v41 = vmul.f32 -1.442695, %v2256_v31  ;;  %v1383_v42 = vmul.f32 -1.442695, %v2259_v32  ;;  %v2272_v43 = vadd.f32 %v2247_v24, %v554_v39  ;;  %v2275_v44 = vadd.f32 %v2247_v24, %v618_v40 }
 0x153   : > { %1754 = vpow2.f32 %v1369_v35  ;;  %v1370_v45 = vmul.f32 -1.442695, %v2264_v37  ;;  %v1386_v46 = vmul.f32 -1.442695, %v2267_v38 }
 0x154   : > { %1756 = vpow2.f32 %v1385_v36  ;;  %v1368_v47 = vmul.f32 -1.442695, %v2272_v43  ;;  %v1384_v48 = vmul.f32 -1.442695, %v2275_v44 }
 0x155   : > { %1758 = vpow2.f32 %v1367_v41 }
 0x156   : > { %1760 = vpow2.f32 %v1383_v42  ;;  %v1611_v49 = vpop.f32.mrb[4].mxu0  ;;  %v1627_v50 = vpop.f32.mrb[4].mxu1 }
 0x157   : > { %1762 = vpow2.f32 %v1370_v45  ;;  %v2282_v51 = vadd.f32 %v1611_v49, %v2247_v24  ;;  %v2285_v52 = vadd.f32 %v1627_v50, %v2247_v24  ;;  %v567_v53 = vpop.f32.mrb[5].mxu0  ;;  %v631_v54 = vpop.f32.mrb[5].mxu1 }
 0x158   : > { %1764 = vpow2.f32 %v1386_v46  ;;  %v2288_v55 = vadd.f32 %v2247_v24, %v567_v53  ;;  %v2291_v56 = vadd.f32 %v2247_v24, %v631_v54  ;;  %v1612_v57 = vpop.f32.mrb[6].mxu0  ;;  %v1628_v58 = vpop.f32.mrb[6].mxu1 }
 0x159   : > { %1766 = vpow2.f32 %v1368_v47  ;;  %v1373_v59 = vmul.f32 -1.442695, %v2282_v51  ;;  %v1389_v60 = vmul.f32 -1.442695, %v2285_v52  ;;  %v2296_v61 = vadd.f32 %v1612_v57, %v2247_v24  ;;  %v570_v62 = vpop.f32.mrb[7].mxu0  ;;  %v634_v63 = vpop.f32.mrb[7].mxu1 }
 0x15a   : > { %1768 = vpow2.f32 %v1384_v48  ;;  %v1371_v0 = vmul.f32 -1.442695, %v2288_v55  ;;  %v1387_v1 = vmul.f32 -1.442695, %v2291_v56  ;;  %v2302_v21 = vadd.f32 %v1628_v58, %v2247_v24 }
 0x15b   : > { %1770 = vpow2.f32 %v1373_v59  ;;  %v1374_v2 = vmul.f32 -1.442695, %v2296_v61  ;;  %v2305_v26 = vadd.f32 %v2247_v24, %v570_v62  ;;  %v2309_v40 = vadd.f32 %v2247_v24, %v634_v63 }
 0x15c   : > { %1772 = vpow2.f32 %v1389_v60  ;;  %v1390_v39 = vmul.f32 -1.442695, %v2302_v21 }
 0x15d   : > { %v1755_v3 = vpop.eup %1754  ;;  %1774 = vpow2.f32 %v1371_v0  ;;  %v1372_v46 = vmul.f32 -1.442695, %v2305_v26 }
 0x15e   : > { %v1757_v4 = vpop.eup %1756  ;;  %v914_v5 = vadd.f32 1.0, %v1755_v3  ;;  %1776 = vpow2.f32 %v1387_v1  ;;  %v1615_v6 = vpop.f32.mrb[8].mxu0 }
 0x15f   : > { %v1631_v7 = vpop.f32.mrb[8].mxu1  ;;  %v1759_v8 = vpop.eup %1758  ;;  %v930_v9 = vadd.f32 1.0, %v1757_v4  ;;  %1778 = vpow2.f32 %v1374_v2  ;;  %v2313_v47 = vadd.f32 %v1615_v6, %v2247_v24 }
 0x160   : > { %v583_v10 = vpop.f32.mrb[9].mxu0  ;;  %v647_v11 = vpop.f32.mrb[9].mxu1  ;;  %1780 = vrcp.f32 %v914_v5  ;;  %v912_v13 = vadd.f32 1.0, %v1759_v8  ;;  %v2318_v54 = vadd.f32 %v1631_v7, %v2247_v24 }
 0x161   : > { %v1761_v12 = vpop.eup %1760  ;;  %v1616_v14 = vpop.f32.mrb[10].mxu0  ;;  %1782 = vrcp.f32 %v930_v9  ;;  %v2321_v57 = vadd.f32 %v2247_v24, %v583_v10  ;;  %v2328_v63 = vadd.f32 %v2247_v24, %v647_v11  ;;  %v1388_v9 = vmul.f32 -1.442695, %v2309_v40 }
 0x162   : > { %v1632_v15 = vpop.f32.mrb[10].mxu1  ;;  %v1763_v16 = vpop.eup %1762  ;;  %v928_v17 = vadd.f32 1.0, %v1761_v12  ;;  %1784 = vrcp.f32 %v912_v13  ;;  %v2331_v0 = vadd.f32 %v1616_v14, %v2247_v24  ;;  %v1377_v11 = vmul.f32 -1.442695, %v2313_v47 }
 0x163   : > { %v586_v18 = vpop.f32.mrb[11].mxu0  ;;  %v1765_v19 = vpop.eup %1764  ;;  %v915_v20 = vadd.f32 1.0, %v1763_v16  ;;  %v2338_v5 = vadd.f32 %v1632_v15, %v2247_v24  ;;  %v1393_v12 = vmul.f32 -1.442695, %v2318_v54  ;;  %v1375_v14 = vmul.f32 -1.442695, %v2321_v57 }
 0x164   : > { %v650_v22 = vpop.f32.mrb[11].mxu1  ;;  %v1767_v23 = vpop.eup %1766  ;;  %1786 = vrcp.f32 %v928_v17  ;;  %v931_v25 = vadd.f32 1.0, %v1765_v19  ;;  %v2341_v6 = vadd.f32 %v2247_v24, %v586_v18  ;;  %v1391_v15 = vmul.f32 -1.442695, %v2328_v63 }
 0x165   : > { %v1769_v29 = vpop.eup %1768  ;;  %1788 = vrcp.f32 %v915_v20  ;;  %v913_v30 = vadd.f32 1.0, %v1767_v23  ;;  %v2351_v16 = vadd.f32 %v2247_v24, %v650_v22  ;;  %v1378_v18 = vmul.f32 -1.442695, %v2331_v0 }
 0x166   : > { %v1771_v33 = vpop.eup %1770  ;;  %1790 = vrcp.f32 %v931_v25  ;;  %v929_v34 = vadd.f32 1.0, %v1769_v29  ;;  %v1619_v41 = vpop.f32.mrb[12].mxu0  ;;  %v1394_v19 = vmul.f32 -1.442695, %v2338_v5  ;;  %v1376_v20 = vmul.f32 -1.442695, %v2341_v6 }
 0x167   : > { %v1773_v35 = vpop.eup %1772  ;;  %1792 = vrcp.f32 %v913_v30  ;;  %v918_v36 = vadd.f32 1.0, %v1771_v33  ;;  %v1635_v48 = vpop.f32.mrb[12].mxu1  ;;  %v2359_v30 = vadd.f32 %v1619_v41, %v2247_v24 }
 0x168   : > { %v1775_v42 = vpop.eup %1774  ;;  %1794 = vrcp.f32 %v929_v34  ;;  %v934_v45 = vadd.f32 1.0, %v1773_v35  ;;  %v2315_v49 = vpop.f32.mrb[13].mxu0  ;;  %v2364_v35 = vadd.f32 %v1635_v48, %v2247_v24 }
 0x169   : > { %v1777_v50 = vpop.eup %1776  ;;  %1796 = vrcp.f32 %v918_v36  ;;  %v916_v53 = vadd.f32 1.0, %v1775_v42  ;;  %v2323_v58 = vpop.f32.mrb[13].mxu1 }
 0x16a   : > { %v2325_v59 = vpop.f32.mrb[14].mxu0  ;;  %v1779_v60 = vpop.eup %1778  ;;  %1798 = vrcp.f32 %v934_v45  ;;  %v932_v62 = vadd.f32 1.0, %v1777_v50  ;;  %v1397_v50 = vmul.f32 -1.442695, %v2364_v35 }
 0x16b   : > { %v2333_v1 = vpop.f32.mrb[14].mxu1  ;;  %v2335_v2 = vpop.f32.mrb[15].mxu0  ;;  %1800 = vrcp.f32 %v916_v53  ;;  %v919_v4 = vadd.f32 1.0, %v1779_v60 }
 0x16c   : > { %v1781_v3 = vpop.eup %1780  ;;  %v2343_v7 = vpop.f32.mrb[15].mxu1  ;;  %1802 = vrcp.f32 %v932_v62 }
 0x16d   : > { %v1783_v8 = vpop.eup %1782  ;;  %1804 = vrcp.f32 %v919_v4  ;;  %v1010_v25 = vmul.f32 %v1781_v3, %v2250_v27 }
 0x16e   : > { %v1785_v10 = vpop.eup %1784  ;;  %1806 = vpow2.f32 %v1390_v39  ;;  %v1026_v22 = vmul.f32 %v1783_v8, %v2253_v28 }
 0x16f   : > { %v1787_v13 = vpop.eup %1786  ;;  %1808 = vpow2.f32 %v1372_v46  ;;  %v1008_v39 = vmul.f32 %v1785_v10, %v2256_v31 }
 0x170   : > { %v1789_v17 = vpop.eup %1788  ;;  %1810 = vpow2.f32 %v1388_v9  ;;  %v1024_v41 = vmul.f32 %v1787_v13, %v2259_v32 }
 0x171   : > { %v1791_v23 = vpop.eup %1790  ;;  %v1011_v29 = vmul.f32 %v1789_v17, %v2264_v37  ;;  %1812 = vpow2.f32 %v1377_v11 }
 0x172   : > { %v1793_v33 = vpop.eup %1792  ;;  %v1027_v34 = vmul.f32 %v1791_v23, %v2267_v38  ;;  %1814 = vpow2.f32 %v1393_v12  ;;  %v1392_v38 = vmul.f32 -1.442695, %v2351_v16 }
 0x173   : > { %v1795_v36 = vpop.eup %1794  ;;  %v1478_v27 = vpack.c.bf16 %v1011_v29, %v1010_v25  ;;  %v1009_v37 = vmul.f32 %v1793_v33, %v2272_v43  ;;  %1816 = vpow2.f32 %v1375_v14  ;;  %v2392_v29 = vadd.f32 %v2247_v24, %v2315_v49 }
 0x174   : > { %v1797_v42 = vpop.eup %1796  ;;  %v1518_v45 = vpack.c.bf16 %v1027_v34, %v1026_v22  ;;  %v1025_v46 = vmul.f32 %v1795_v36, %v2275_v44  ;;  %1818 = vpow2.f32 %v1391_v15  ;;  %v1381_v44 = vmul.f32 -1.442695, %v2359_v30 }
 0x175   : > { %v2370_v28 = vpop.eup %1798  ;;  %1550 = vst [vmem:[%s2374_s24 + $0x8] sm:$0xff] %v1478_v27   ;;  %v1473_v31 = vpack.c.bf16 %v1009_v37, %v1008_v39  ;;  %1820 = vpow2.f32 %v1378_v18  ;;  %v1014_v62 = vmul.f32 %v1797_v42, %v2282_v51  ;;  %v2396_v34 = vadd.f32 %v2247_v24, %v2323_v58 }
 0x176   : > { %v2378_v43 = vpop.eup %1800  ;;  %1558 = vst [vmem:[%s2374_s24 + $0x48] sm:$0xff] %v1518_v45   ;;  %v1513_v32 = vpack.c.bf16 %v1025_v46, %v1024_v41  ;;  %1822 = vpow2.f32 %v1394_v19  ;;  %v2400_v27 = vadd.f32 %v2325_v59, %v2247_v24  ;;  %v2404_v49 = vadd.f32 %v2333_v1, %v2247_v24 }
 0x177   : > { %v2382_v48 = vpop.eup %1802  ;;  %1474 = vst [vmem:[%s2374_s24] sm:$0xff] %v1473_v31   ;;  %1824 = vpow2.f32 %v1376_v20  ;;  %v2408_v41 = vadd.f32 %v2247_v24, %v2335_v2  ;;  %v1379_v45 = vmul.f32 -1.442695, %v2392_v29  ;;  %v1395_v59 = vmul.f32 -1.442695, %v2396_v34 }
 0x178   : > { %v1805_v53 = vpop.eup %1804  ;;  %1557 = vst [vmem:[%s2374_s24 + $0x40] sm:$0xff] %v1513_v32   ;;  %1826 = vpow2.f32 %v1392_v38  ;;  %v2414_v31 = vadd.f32 %v2247_v24, %v2343_v7  ;;  %v1030_v1 = vmul.f32 %v2370_v28, %v2285_v52  ;;  %v1382_v2 = vmul.f32 -1.442695, %v2400_v27 }
 0x179   : > { %v1807_v60 = vpop.eup %1806  ;;  %v1015_v3 = vmul.f32 %v1805_v53, %v2296_v61  ;;  %1828 = vpow2.f32 %v1381_v44  ;;  %v1380_v24 = vmul.f32 -1.442695, %v2408_v41  ;;  %v1028_v52 = vmul.f32 %v2382_v48, %v2291_v56 }
 0x17a   : > { %v1809_v4 = vpop.eup %1808  ;;  %v935_v8 = vadd.f32 1.0, %v1807_v60  ;;  %1830 = vpow2.f32 %v1397_v50  ;;  %v1012_v50 = vmul.f32 %v2378_v43, %v2288_v55  ;;  %v1398_v60 = vmul.f32 -1.442695, %v2404_v49 }
 0x17b   : > { %v1811_v9 = vpop.eup %1810  ;;  %v1488_v10 = vpack.c.bf16 %v1015_v3, %v1014_v62  ;;  %v917_v11 = vadd.f32 1.0, %v1809_v4  ;;  %v1396_v55 = vmul.f32 -1.442695, %v2414_v31 }
 0x17c   : > { %v1813_v12 = vpop.eup %1812  ;;  %1832 = vrcp.f32 %v935_v8  ;;  %v933_v13 = vadd.f32 1.0, %v1811_v9 }
 0x17d   : > { %v1815_v14 = vpop.eup %1814  ;;  %1552 = vst [vmem:[%s2374_s24 + $0x18] sm:$0xff] %v1488_v10   ;;  %1834 = vrcp.f32 %v917_v11  ;;  %v922_v15 = vadd.f32 1.0, %v1813_v12 }
 0x17e   : > { %v1817_v17 = vpop.eup %1816  ;;  %1836 = vrcp.f32 %v933_v13  ;;  %v938_v51 = vadd.f32 1.0, %v1815_v14 }
 0x17f   : > { %v1819_v18 = vpop.eup %1818  ;;  %1838 = vrcp.f32 %v922_v15  ;;  %v920_v61 = vadd.f32 1.0, %v1817_v17 }
 0x180   : > { %v1821_v19 = vpop.eup %1820  ;;  %1840 = vrcp.f32 %v938_v51  ;;  %v936_v20 = vadd.f32 1.0, %v1819_v18 }
 0x181   : > { %v1823_v23 = vpop.eup %1822  ;;  %1842 = vrcp.f32 %v920_v61  ;;  %v923_v25 = vadd.f32 1.0, %v1821_v19 }
 0x182   : > { %v1825_v33 = vpop.eup %1824  ;;  %1844 = vrcp.f32 %v936_v20  ;;  %v939_v22 = vadd.f32 1.0, %v1823_v23 }
 0x183   : > { %v1827_v36 = vpop.eup %1826  ;;  %1846 = vrcp.f32 %v923_v25  ;;  %v921_v39 = vadd.f32 1.0, %v1825_v33 }
 0x184   : > { %v1829_v37 = vpop.eup %1828  ;;  %1848 = vrcp.f32 %v939_v22  ;;  %v937_v42 = vadd.f32 1.0, %v1827_v36 }
 0x185   : > { %v1831_v58 = vpop.eup %1830  ;;  %1850 = vrcp.f32 %v921_v39  ;;  %v926_v17 = vadd.f32 1.0, %v1829_v37 }
 0x186   : > { %v1833_v46 = vpop.eup %1832  ;;  %1852 = vrcp.f32 %v937_v42  ;;  %v942_v18 = vadd.f32 1.0, %v1831_v58 }
 0x187   : > { %v1835_v38 = vpop.eup %1834  ;;  %v1031_v32 = vmul.f32 %v1833_v46, %v2302_v21  ;;  %1854 = vpow2.f32 %v1379_v45 }
 0x188   : > { %v1837_v44 = vpop.eup %1836  ;;  %v1013_v53 = vmul.f32 %v1835_v38, %v2305_v26  ;;  %1856 = vpow2.f32 %v1395_v59 }
 0x189   : > { %v1839_v7 = vpop.eup %1838  ;;  %v1528_v21 = vpack.c.bf16 %v1031_v32, %v1030_v1  ;;  %v1029_v28 = vmul.f32 %v1837_v44, %v2309_v40  ;;  %1858 = vpow2.f32 %v1382_v2 }
 0x18a   : > { %v1841_v62 = vpop.eup %1840  ;;  %v1483_v3 = vpack.c.bf16 %v1013_v53, %v1012_v50  ;;  %1860 = vpow2.f32 %v1398_v60  ;;  %v1018_v40 = vmul.f32 %v1839_v7, %v2313_v47 }
 0x18b   : > { %v1843_v26 = vpop.eup %1842  ;;  %1560 = vst [vmem:[%s2374_s24 + $0x58] sm:$0xff] %v1528_v21   ;;  %v1523_v43 = vpack.c.bf16 %v1029_v28, %v1028_v52  ;;  %1862 = vpow2.f32 %v1380_v24  ;;  %v1034_v10 = vmul.f32 %v1841_v62, %v2318_v54 }
 0x18c   : > { %v1845_v4 = vpop.eup %1844  ;;  %1551 = vst [vmem:[%s2374_s24 + $0x10] sm:$0xff] %v1483_v3   ;;  %1864 = vpow2.f32 %v1396_v55  ;;  %v1016_v13 = vmul.f32 %v1843_v26, %v2321_v57 }
 0x18d   : > { %v1847_v8 = vpop.eup %1846  ;;  %1559 = vst [vmem:[%s2374_s24 + $0x50] sm:$0xff] %v1523_v43   ;;  %v1032_v47 = vmul.f32 %v1845_v4, %v2328_v63  ;;  %1866 = vrcp.f32 %v926_v17 }
 0x18e   : > { %v1849_v56 = vpop.eup %1848  ;;  %v1019_v48 = vmul.f32 %v1847_v8, %v2331_v0  ;;  %1868 = vrcp.f32 %v942_v18 }
 0x18f   : > { %v1851_v9 = vpop.eup %1850  ;;  %v1035_v11 = vmul.f32 %v1849_v56, %v2338_v5 }
 0x190   : > { %v1853_v12 = vpop.eup %1852  ;;  %v1498_v14 = vpack.c.bf16 %v1019_v48, %v1018_v40  ;;  %v1017_v15 = vmul.f32 %v1851_v9, %v2341_v6 }
 0x191   : > { %v1538_v51 = vpack.c.bf16 %v1035_v11, %v1034_v10  ;;  %v1033_v0 = vmul.f32 %v1853_v12, %v2351_v16  ;;  %v1855_v54 = vpop.eup %1854 }
 0x192   : > { %1554 = vst [vmem:[%s2374_s24 + $0x28] sm:$0xff] %v1498_v14   ;;  %v1493_v61 = vpack.c.bf16 %v1017_v15, %v1016_v13  ;;  %v1857_v19 = vpop.eup %1856  ;;  %v924_v57 = vadd.f32 1.0, %v1855_v54 }
 0x193   : > { %1562 = vst [vmem:[%s2374_s24 + $0x68] sm:$0xff] %v1538_v51   ;;  %v1533_v5 = vpack.c.bf16 %v1033_v0, %v1032_v47  ;;  %v1859_v20 = vpop.eup %1858  ;;  %v940_v6 = vadd.f32 1.0, %v1857_v19 }
 0x194   : > { %1553 = vst [vmem:[%s2374_s24 + $0x20] sm:$0xff] %v1493_v61   ;;  %v1861_v23 = vpop.eup %1860  ;;  %1870 = vrcp.f32 %v924_v57  ;;  %v927_v63 = vadd.f32 1.0, %v1859_v20 }
 0x195   : > { %1561 = vst [vmem:[%s2374_s24 + $0x60] sm:$0xff] %v1533_v5   ;;  %v1863_v25 = vpop.eup %1862  ;;  %1872 = vrcp.f32 %v940_v6  ;;  %v943_v16 = vadd.f32 1.0, %v1861_v23 }
 0x196   : > { %v1865_v33 = vpop.eup %1864  ;;  %1874 = vrcp.f32 %v927_v63  ;;  %v925_v22 = vadd.f32 1.0, %v1863_v25 }
 0x197   : > { %1876 = vrcp.f32 %v943_v16  ;;  %v941_v36 = vadd.f32 1.0, %v1865_v33  ;;  %v1867_v39 = vpop.eup %1866 }
 0x198   : > { %1878 = vrcp.f32 %v925_v22  ;;  %v1869_v37 = vpop.eup %1868  ;;  %v1022_v59 = vmul.f32 %v1867_v39, %v2359_v30 }
 0x199   : > { %1880 = vrcp.f32 %v941_v36  ;;  %v1038_v32 = vmul.f32 %v1869_v37, %v2364_v35 }
 0x19e   : > { %v1871_v42 = vpop.eup %1870 }
 0x19f   : > { %v1873_v58 = vpop.eup %1872  ;;  %v1020_v50 = vmul.f32 %v1871_v42, %v2392_v29 }
 0x1a0   : > { %v1875_v45 = vpop.eup %1874 }
 0x1a1   : > { %v1877_v46 = vpop.eup %1876  ;;  %v1023_v38 = vmul.f32 %v1875_v45, %v2400_v27  ;;  %v1036_v27 = vmul.f32 %v1873_v58, %v2396_v34 }
 0x1a2   : > { %v1879_v1 = vpop.eup %1878  ;;  %v1039_v2 = vmul.f32 %v1877_v46, %v2404_v49 }
 0x1a3   : > { %v1881_v44 = vpop.eup %1880  ;;  %v1508_v53 = vpack.c.bf16 %v1023_v38, %v1022_v59  ;;  %v1021_v30 = vmul.f32 %v1879_v1, %v2408_v41 }
 0x1a4   : > { %v1548_v60 = vpack.c.bf16 %v1039_v2, %v1038_v32  ;;  %v1037_v24 = vmul.f32 %v1881_v44, %v2414_v31 }
 0x1a5   : > { %1556 = vst [vmem:[%s2374_s24 + $0x38] sm:$0xff] %v1508_v53   ;;  %v1503_v35 = vpack.c.bf16 %v1021_v30, %v1020_v50 }
 0x1a6   : > { %1564 = vst [vmem:[%s2374_s24 + $0x78] sm:$0xff] %v1548_v60   ;;  %v1543_v29 = vpack.c.bf16 %v1037_v24, %v1036_v27 }
 0x1a7   : > { %1555 = vst [vmem:[%s2374_s24 + $0x30] sm:$0xff] %v1503_v35  }
 0x1a8   : > { %1563 = vst [vmem:[%s2374_s24 + $0x70] sm:$0xff] %v1543_v29  }
 0x1a9   : > { %1953 = shalt.err (!%p1950_p5)
}
 0x1aa   : > { %s1954_s6 = scalar_lea.hbm %s2458_s15, 2048  ;;  %s1958_s19 = scalar_lea.hbm %s2514_s3, 16384 }
 0x1ab   : > { %p1955_p9 = scmp.ne.s32.totalorder %s2458_s15, %s1954_s6  ;;  %p1959_p3 = scmp.lt.u32.totalorder %s2458_s15, %s2514_s3 }
 0x1ac   : > { %p1960_p7 = scmp.lt.u32.totalorder %s1958_s19, %s1954_s6  ;;  %p1962_p4 = scmp.lt.u32.totalorder %s1954_s6, %s2458_s15 }
 0x1ad   : > { %p1956_p1 = pnand %p1955_p9, %p2153_p11 }
 0x1ae   : > { %p1961_p13 = por %p1960_p7, %p1959_p3 }
 0x1af   : > { %p1957_p2 = pneg %p1956_p1 }
 0x1b0   : > { %p1963_p6 = por %p1962_p4, %p1961_p13 }
 0x1b2   : > { %p1964_p8 = pnand %p1963_p6, %p1957_p2 }
 0x1b4   : > { %1967 = shalt.err (!%p1964_p8)
}
 0x1b5   : > { %s2033_s24 = smov 64   ;;  %s2034_s10 = smov 4  }
 0x1b6   : > { %1659 = dma.vmem_to_hbm [thread:$0]  (%p2153_p11), %s2460_s11, 2048, %s2458_s15, %s1201_s25, %s2033_s24, %s2033_s24, %s2034_s10  }
 0x1b7 PF: > { %p1676_p12 = scmp.ge.s32.totalorder %s2026_s17, 2  ;;  %s1230_s9 = sand.u32 1, %s2006_s12  }
 0x1b8   : > { %p2532_p10 = scmp.ne.s32.totalorder %s2522_s23, 0  ;;  %s1231_s18 = scalar_lea.sflag [#allocation5], %s1230_s9 }
 0x1ba   : > { %p1670_p0 = pnand %p1676_p12, %p2532_p10 }
 0x1bc   : > { %2001 = dma.done.wait (!%p1670_p0), %s1231_s18, 2048  }
 0x1bd   : > { %2003 = vsyncadd (!%p1670_p0), %s1231_s18, 4294965248  ;;  %s20_s17 = sadd.s32 1, %s2026_s17   ;;  %s2533_s12 = smov %s2010_s13 }
 0x1be   : > { %p17_p5 = scmp.ge.s32.totalorder %s20_s17, 10   ;;  %s2534_s13 = smov %s2014_s14 }
 0x1bf   : > { %s2535_s14 = smov %s2162_s5  ;;  %s2536_s15 = smov %s2022_s16 }
 0x1c0   : > { %s2537_s16 = smov %s2539_s28  ;;  %19 = sbr.rel (!%p17_p5) target bundleno = 7 (0x7), region = 93 }
 0x1c7   :  { %1236 = vsyncpa [#allocation4], 1 }
 0x1c8   :  { %1238 = vsyncpa [#allocation4 + $0x1], 1 }
 0x1c9   :  { %1239 = vsyncpa [#allocation7], 1 }
 0x1ca   :  { %1240 = vsyncpa [#allocation5], 1 }
 0x1cb   :  { %1242 = vsyncpa [#allocation5 + $0x1], 1 }

</bundles_post_ra>
